<compile_context>
chip_gen: v5e
topology: v5e:2x2
jax: 0.10.0
libtpu: 0.0.40
codegen_flags: <defaults>
</compile_context>

<pallas_src>
from functools import partial

import jax
import jax.numpy as jnp
from jax.experimental import pallas as pl
from jax.experimental.pallas import tpu as pltpu


def _round_up(x, m):
    return (x + m - 1) // m * m


def _make_ssd_loss_kernel(num_classes, tiles_per_core, tile, num_anchors):
    C = num_classes

    def kernel(loc_p_ref, loc_t_ref, cls_p_ref, cls_t_ref,
               loc_out_ref, cls_out_ref, pos_out_ref):
        c = pl.program_id(0)   # core chunk (parallel)
        i = pl.program_id(1)   # tile within chunk (arbitrary / reduction)

        @pl.when(i == 0)
        def _():
            loc_out_ref[...] = jnp.zeros_like(loc_out_ref)
            cls_out_ref[...] = jnp.zeros_like(cls_out_ref)
            pos_out_ref[...] = jnp.zeros_like(pos_out_ref)

        # Validity mask: handles (a) the ragged last tile (no wrapper pad) and
        # (b) the clamped duplicate tile the second core sees for odd tile counts.
        base = (c * tiles_per_core + i) * tile
        lane = jax.lax.broadcasted_iota(jnp.int32, (1, tile), 1)
        valid = (base + lane) < num_anchors                      # (1, T)

        t_raw = cls_t_ref[...]                                   # (1, T) int32
        ign = t_raw < 0
        t = jnp.where(ign, 0, t_raw)                             # ignored -> class 0 (matches in-place write)
        pos = jnp.logical_and(t > 0, valid)                      # (1, T)
        keep = jnp.logical_and(jnp.logical_not(ign), valid)      # anchors contributing to cls loss

        # ---- localization: smooth-L1 (beta = 1.0), positives only ----
        d = loc_p_ref[...].astype(jnp.float32) - loc_t_ref[...].astype(jnp.float32)   # (4, T)
        ad = jnp.abs(d)
        sl1 = jnp.where(ad < 1.0, 0.5 * ad * ad, ad - 0.5)
        per_anchor = jnp.sum(sl1, axis=0, keepdims=True)         # (1, T)  XLU sublane reduce over coords
        loc_s = jnp.sum(jnp.where(pos, per_anchor, 0.0), axis=1, keepdims=True)        # (1, 1)

        # ---- classification: softmax focal loss (gamma = 2), classes on sublanes ----
        x = cls_p_ref[...].astype(jnp.float32)                   # (C, T)
        m = jnp.max(x, axis=0, keepdims=True)                    # (1, T)  XLU
        e = jnp.exp(x - m)                                       # EUP
        lse = m + jnp.log(jnp.sum(e, axis=0, keepdims=True))     # (1, T)
        onehot = jax.lax.broadcasted_iota(jnp.int32, (C, tile), 0) == t
        # TODO(synk): labels >= num_classes give x_y = 0 (an implicit zero logit)
        # instead of gather/clamp semantics; only matters for malformed targets.
        x_y = jnp.sum(jnp.where(onehot, x, 0.0), axis=0, keepdims=True)                # (1, T)
        ce = x_y - lse                                           # log_softmax picked at target class
        pt = jnp.exp(ce)
        w = (1.0 - pt) * (1.0 - pt)                              # (1 - pt)^gamma, gamma = 2
        floss = jnp.where(keep, -(w * ce), 0.0)                  # (1, T)
        cls_s = jnp.sum(floss, axis=1, keepdims=True)            # (1, 1)

        pos_s = jnp.sum(pos.astype(jnp.float32), axis=1, keepdims=True)                # (1, 1)

        # Accumulate directly into the resident output blocks (one per core chunk).
        loc_out_ref[...] += loc_s
        cls_out_ref[...] += cls_s
        pos_out_ref[...] += pos_s

    return kernel


def _padded_block_bytes_per_lane(sublanes, dtype):
    """VMEM bytes per lane of a (sublanes, T) block, including sublane padding."""
    itemsize = jnp.dtype(dtype).itemsize
    pack = max(1, 4 // itemsize)                 # sub-32-bit dtypes pack along sublanes
    phys_sublanes = _round_up(max(int(sublanes), 1), 8 * pack)
    return phys_sublanes * itemsize


def ssd_loss(loc_preds, loc_targets, cls_preds, cls_targets, *,
             compute_dtype=None, anchor_tile=None):
    """Returns (loc_loss, cls_loss) scalars, matching SSDLoss(mode='focal').forward."""
    N, A, _ = loc_preds.shape
    C = cls_preds.shape[-1]
    M0 = N * A

    pdt = jnp.float32 if compute_dtype is None else compute_dtype

    # Flatten batch into the anchor axis (free) and put anchors on the 128-lane
    # axis.  The transpose is the single wrapper-side data-movement pass; the
    # optional cast fuses into it.  There is NO separate pad pass.
    loc_p = loc_preds.reshape(M0, 4).astype(pdt).T        # [4, M0]
    loc_t = loc_targets.reshape(M0, 4).astype(pdt).T      # [4, M0]
    cls_p = cls_preds.reshape(M0, C).astype(pdt).T        # [C, M0]
    cls_t = cls_targets.reshape(1, M0).astype(jnp.int32)  # [1, M0]
    # TODO(synk): cls_targets could be int8 for an extra 3 B/anchor of HBM, but
    # it buys no VMEM (sublane padding) so it is left as int32.

    # ---- VMEM-aware tile sizing (sublane padding + double buffering + temps) ----
    per_lane_inputs = 2 * (                      # double-buffered input blocks
        2 * _padded_block_bytes_per_lane(4, pdt)           # loc_p + loc_t
        + _padded_block_bytes_per_lane(C, pdt)             # cls_p
        + _padded_block_bytes_per_lane(1, jnp.int32))      # cls_t
    per_lane_temps = 8 * _padded_block_bytes_per_lane(8, jnp.float32)  # f32 intermediates headroom
    per_lane = per_lane_inputs + per_lane_temps

    try:
        vmem_cap = int(pltpu.get_tpu_info().vmem_capacity_bytes)
    except Exception:
        vmem_cap = 64 * 1024 * 1024              # safe for every generation
    vmem_limit = int(vmem_cap * 0.70)
    block_budget = int(vmem_cap * 0.35)

    if anchor_tile is None:
        t = (block_budget // per_lane) // 128 * 128
        # No point tiling wider than one core chunk of the anchors.
        t = min(t, _round_up(pl.cdiv(M0, 2), 128))
        anchor_tile = max(128, t)
    T = int(anchor_tile)
    assert T % 128 == 0

    nt = pl.cdiv(M0, T)          # total anchor tiles
    tpc = pl.cdiv(nt, 2)         # tiles per core chunk (leading parallel axis)
    grid = (2, tpc)

    def in_idx(c, i):
        # Clamp so a possible extra tile on the second core re-reads the last
        # real tile instead of issuing an out-of-bounds DMA; the kernel's
        # validity mask zeroes its contribution.
        return (0, jnp.minimum(c * tpc + i, nt - 1))

    kernel = _make_ssd_loss_kernel(C, tpc, T, M0)

    out_sds = jax.ShapeDtypeStruct((2, 1, 128), jnp.float32)
    out_spec = pl.BlockSpec((1, 1, 128), lambda c, i: (c, 0, 0))

    loc_part, cls_part, pos_part = pl.pallas_call(
        kernel,
        out_shape=(out_sds, out_sds, out_sds),
        grid=grid,
        in_specs=[
            pl.BlockSpec((4, T), in_idx),
            pl.BlockSpec((4, T), in_idx),
            pl.BlockSpec((C, T), in_idx),
            pl.BlockSpec((1, T), in_idx),
        ],
        out_specs=[out_spec, out_spec, out_spec],
        compiler_params=pltpu.CompilerParams(
            dimension_semantics=("parallel", "arbitrary"),
            vmem_limit_bytes=vmem_limit,
        ),
    )(loc_p, loc_t, cls_p, cls_t)

    loc_sum = loc_part[:, 0, 0].sum()
    cls_sum = cls_part[:, 0, 0].sum()
    num_pos = pos_part[:, 0, 0].sum()
    # TODO(synk): num_pos == 0 yields inf/nan, matching the unclamped PyTorch code.
    return loc_sum / num_pos, cls_sum / num_pos


def ssd_loss_ref(loc_preds, loc_targets, cls_preds, cls_targets):
    """Pure-JAX reference mirroring the PyTorch forward (mode='focal')."""
    mask_ign = cls_targets < 0
    t = jnp.where(mask_ign, 0, cls_targets)
    pos = t > 0
    num_pos = jnp.sum(pos).astype(jnp.float32)

    diff = jnp.abs(loc_preds - loc_targets)
    sl1 = jnp.where(diff < 1.0, 0.5 * diff * diff, diff - 0.5)
    loc_loss = jnp.sum(sl1 * pos[..., None].astype(jnp.float32)) / num_pos

    logp = jax.nn.log_softmax(cls_preds, axis=-1)
    ce = jnp.take_along_axis(logp, t[..., None], axis=-1)[..., 0]
    pt = jnp.exp(ce)
    floss = -((1.0 - pt) ** 2 * ce)
    floss = jnp.where(mask_ign, 0.0, floss)
    cls_loss = jnp.sum(floss) / num_pos
    return loc_loss, cls_loss


if __name__ == "__main__":
    num_classes = 8
    N, A = 2, 256

    # __init__ creates alpha = ones(num_classes); it is never used in forward().
    alpha = jnp.ones((num_classes,), jnp.float32)  # TODO(synk): alpha unused in forward().

    key = jax.random.PRNGKey(0)
    k1, k2, k3, k4 = jax.random.split(key, 4)
    loc_preds = jax.random.normal(k1, (N, A, 4), jnp.float32)
    loc_targets = jax.random.normal(k2, (N, A, 4), jnp.float32)
    cls_preds = jax.random.normal(k3, (N, A, num_classes), jnp.float32)
    # labels in [-1, num_classes-1]: -1 = ignore, 0 = background, >0 = positive
    cls_targets = jax.random.randint(k4, (N, A), -1, num_classes, jnp.int32)
    cls_targets = cls_targets.at[0, 0].set(1)  # guarantee at least one positive

    ssd_loss_f32 = jax.jit(ssd_loss)
    ssd_loss_bf16 = jax.jit(partial(ssd_loss, compute_dtype=jnp.bfloat16))

    loc_loss, cls_loss = ssd_loss_f32(loc_preds, loc_targets, cls_preds, cls_targets)
    jax.block_until_ready((loc_loss, cls_loss))

    loc_ref, cls_ref = ssd_loss_ref(loc_preds, loc_targets, cls_preds, cls_targets)
    assert jnp.allclose(loc_loss, loc_ref, rtol=1e-5, atol=1e-5), (loc_loss, loc_ref)
    assert jnp.allclose(cls_loss, cls_ref, rtol=1e-5, atol=1e-5), (cls_loss, cls_ref)

    # Reduced-precision input path for bandwidth-bound generations (v5e): the
    # bf16 cast fuses into the wrapper transpose; the kernel widens back to f32.
    loc_bf, cls_bf = ssd_loss_bf16(loc_preds, loc_targets, cls_preds, cls_targets)
    jax.block_until_ready((loc_bf, cls_bf))
    assert jnp.allclose(loc_bf, loc_ref, rtol=5e-2, atol=5e-2), (loc_bf, loc_ref)
    assert jnp.allclose(cls_bf, cls_ref, rtol=5e-2, atol=5e-2), (cls_bf, cls_ref)

    print("KERNEL_OK")
</pallas_src>

<mosaic_0001>
module attributes {stable_mosaic.version = 11 : i64} {
  func.func @kernel(%arg0: i32, %arg1: i32, %arg2: memref<4x256xf32, #tpu.memory_space<vmem>>, %arg3: memref<4x256xf32, #tpu.memory_space<vmem>>, %arg4: memref<8x256xf32, #tpu.memory_space<vmem>>, %arg5: memref<1x256xi32, #tpu.memory_space<vmem>>, %arg6: memref<1x1x128xf32, #tpu.memory_space<vmem>>, %arg7: memref<1x1x128xf32, #tpu.memory_space<vmem>>, %arg8: memref<1x1x128xf32, #tpu.memory_space<vmem>>) attributes {dimension_semantics = [#tpu.dimension_semantics<parallel>, #tpu.dimension_semantics<arbitrary>], iteration_bounds = array<i64: 2, 1>, scalar_prefetch = 0 : i64, scratch_operands = 0 : i64, tpu.core_type = #tpu.core_type<tc>, window_params = [{transform_indices = @transform_0, window_bounds = array<i64: 4, 256>}, {transform_indices = @transform_1, window_bounds = array<i64: 4, 256>}, {transform_indices = @transform_2, window_bounds = array<i64: 8, 256>}, {transform_indices = @transform_3, window_bounds = array<i64: 1, 256>}, {transform_indices = @transform_4, window_bounds = array<i64: 1, 1, 128>}, {transform_indices = @transform_5, window_bounds = array<i64: 1, 1, 128>}, {transform_indices = @transform_6, window_bounds = array<i64: 1, 1, 128>}]} {
    %c0_i32 = arith.constant 0 : i32
    %0 = arith.cmpi eq, %arg1, %c0_i32 : i32
    %1 = arith.extui %0 : i1 to i32
    %c0_i32_0 = arith.constant 0 : i32
    %2 = arith.cmpi ne, %1, %c0_i32_0 : i32
    scf.if %2 {
      %cst_45 = arith.constant 0.000000e+00 : f32
      %89 = vector.broadcast %cst_45 : f32 to vector<1x1x128xf32>
      %c0_46 = arith.constant 0 : index
      %c0_47 = arith.constant 0 : index
      %c0_48 = arith.constant 0 : index
      %90 = vector.load %arg6[%c0_46, %c0_47, %c0_48] : memref<1x1x128xf32, #tpu.memory_space<vmem>>, vector<1x1x128xf32>
      tpu.vector_store %arg6[%c0_46, %c0_47, %c0_48], %89 {strides = array<i32>} : memref<1x1x128xf32, #tpu.memory_space<vmem>>, vector<1x1x128xf32>,
      %cst_49 = arith.constant 0.000000e+00 : f32
      %91 = vector.broadcast %cst_49 : f32 to vector<1x1x128xf32>
      %c0_50 = arith.constant 0 : index
      %c0_51 = arith.constant 0 : index
      %c0_52 = arith.constant 0 : index
      %92 = vector.load %arg7[%c0_50, %c0_51, %c0_52] : memref<1x1x128xf32, #tpu.memory_space<vmem>>, vector<1x1x128xf32>
      tpu.vector_store %arg7[%c0_50, %c0_51, %c0_52], %91 {strides = array<i32>} : memref<1x1x128xf32, #tpu.memory_space<vmem>>, vector<1x1x128xf32>,
      %cst_53 = arith.constant 0.000000e+00 : f32
      %93 = vector.broadcast %cst_53 : f32 to vector<1x1x128xf32>
      %c0_54 = arith.constant 0 : index
      %c0_55 = arith.constant 0 : index
      %c0_56 = arith.constant 0 : index
      %94 = vector.load %arg8[%c0_54, %c0_55, %c0_56] : memref<1x1x128xf32, #tpu.memory_space<vmem>>, vector<1x1x128xf32>
      tpu.vector_store %arg8[%c0_54, %c0_55, %c0_56], %93 {strides = array<i32>} : memref<1x1x128xf32, #tpu.memory_space<vmem>>, vector<1x1x128xf32>,
    } else {
    }
    %c1_i32 = arith.constant 1 : i32
    %3 = arith.muli %arg0, %c1_i32 : i32
    %4 = arith.addi %3, %arg1 : i32
    %c256_i32 = arith.constant 256 : i32
    %5 = arith.muli %4, %c256_i32 : i32
    %6 = tpu.iota {dimensions = array<i32: 1>} : vector<1x256xi32>
    %7 = vector.broadcast %5 : i32 to vector<1x256xi32>
    %8 = arith.addi %7, %6 : vector<1x256xi32>
    %c512_i32 = arith.constant 512 : i32
    %9 = vector.broadcast %c512_i32 : i32 to vector<1x256xi32>
    %10 = arith.cmpi slt, %8, %9 : vector<1x256xi32>
    %c0 = arith.constant 0 : index
    %c0_1 = arith.constant 0 : index
    %11 = vector.load %arg5[%c0, %c0_1] : memref<1x256xi32, #tpu.memory_space<vmem>>, vector<1x256xi32>
    %c0_i32_2 = arith.constant 0 : i32
    %12 = vector.broadcast %c0_i32_2 : i32 to vector<1x256xi32>
    %13 = arith.cmpi slt, %11, %12 : vector<1x256xi32>
    %c0_i32_3 = arith.constant 0 : i32
    %14 = vector.broadcast %c0_i32_3 : i32 to vector<1x256xi32>
    %15 = arith.select %13, %14, %11 : vector<1x256xi1>, vector<1x256xi32>
    %c0_i32_4 = arith.constant 0 : i32
    %16 = vector.broadcast %c0_i32_4 : i32 to vector<1x256xi32>
    %17 = arith.cmpi sgt, %15, %16 : vector<1x256xi32>
    %18 = arith.andi %17, %10 : vector<1x256xi1>
    %cst = arith.constant dense<true> : vector<1x256xi1>
    %19 = arith.xori %13, %cst : vector<1x256xi1>
    %20 = arith.andi %19, %10 : vector<1x256xi1>
    %c0_5 = arith.constant 0 : index
    %c0_6 = arith.constant 0 : index
    %21 = vector.load %arg2[%c0_5, %c0_6] : memref<4x256xf32, #tpu.memory_space<vmem>>, vector<4x256xf32>
    %c0_7 = arith.constant 0 : index
    %c0_8 = arith.constant 0 : index
    %22 = vector.load %arg3[%c0_7, %c0_8] : memref<4x256xf32, #tpu.memory_space<vmem>>, vector<4x256xf32>
    %23 = arith.subf %21, %22 : vector<4x256xf32>
    %24 = math.absf %23 : vector<4x256xf32>
    %cst_9 = arith.constant 1.000000e+00 : f32
    %25 = vector.broadcast %cst_9 : f32 to vector<4x256xf32>
    %26 = arith.cmpf olt, %24, %25 : vector<4x256xf32>
    %cst_10 = arith.constant 5.000000e-01 : f32
    %27 = vector.broadcast %cst_10 : f32 to vector<4x256xf32>
    %28 = arith.mulf %27, %24 : vector<4x256xf32>
    %29 = arith.mulf %28, %24 : vector<4x256xf32>
    %cst_11 = arith.constant 5.000000e-01 : f32
    %30 = vector.broadcast %cst_11 : f32 to vector<4x256xf32>
    %31 = arith.subf %24, %30 : vector<4x256xf32>
    %32 = arith.select %26, %29, %31 : vector<4x256xi1>, vector<4x256xf32>
    %cst_12 = arith.constant dense<0.000000e+00> : vector<256xf32>
    %33 = vector.multi_reduction <add>, %32, %cst_12 [0] : vector<4x256xf32> to vector<256xf32>
    %34 = vector.shape_cast %33 : vector<256xf32> to vector<1x256xf32>
    %cst_13 = arith.constant 0.000000e+00 : f32
    %35 = vector.broadcast %cst_13 : f32 to vector<1x256xf32>
    %36 = arith.select %18, %34, %35 : vector<1x256xi1>, vector<1x256xf32>
    %cst_14 = arith.constant dense<0.000000e+00> : vector<1xf32>
    %37 = vector.multi_reduction <add>, %36, %cst_14 [1] : vector<1x256xf32> to vector<1xf32>
    %38 = vector.shape_cast %37 : vector<1xf32> to vector<1x1xf32>
    %c0_15 = arith.constant 0 : index
    %c0_16 = arith.constant 0 : index
    %39 = vector.load %arg4[%c0_15, %c0_16] : memref<8x256xf32, #tpu.memory_space<vmem>>, vector<8x256xf32>
    %cst_17 = arith.constant dense<0xFF800000> : vector<256xf32>
    %40 = vector.multi_reduction <maximumf>, %39, %cst_17 [0] : vector<8x256xf32> to vector<256xf32>
    %41 = vector.shape_cast %40 : vector<256xf32> to vector<1x256xf32>
    %42 = vector.broadcast %41 : vector<1x256xf32> to vector<8x256xf32>
    %43 = arith.subf %39, %42 : vector<8x256xf32>
    %44 = math.exp %43 : vector<8x256xf32>
    %cst_18 = arith.constant dense<0.000000e+00> : vector<256xf32>
    %45 = vector.multi_reduction <add>, %44, %cst_18 [0] : vector<8x256xf32> to vector<256xf32>
    %46 = vector.shape_cast %45 : vector<256xf32> to vector<1x256xf32>
    %47 = math.log %46 : vector<1x256xf32>
    %48 = arith.addf %41, %47 : vector<1x256xf32>
    %49 = tpu.iota {dimensions = array<i32: 0>} : vector<8x256xi32>
    %50 = vector.broadcast %15 : vector<1x256xi32> to vector<8x256xi32>
    %51 = arith.cmpi eq, %49, %50 : vector<8x256xi32>
    %cst_19 = arith.constant 0.000000e+00 : f32
    %52 = vector.broadcast %cst_19 : f32 to vector<8x256xf32>
    %53 = arith.select %51, %39, %52 : vector<8x256xi1>, vector<8x256xf32>
    %cst_20 = arith.constant dense<0.000000e+00> : vector<256xf32>
    %54 = vector.multi_reduction <add>, %53, %cst_20 [0] : vector<8x256xf32> to vector<256xf32>
    %55 = vector.shape_cast %54 : vector<256xf32> to vector<1x256xf32>
    %56 = arith.subf %55, %48 : vector<1x256xf32>
    %57 = math.exp %56 : vector<1x256xf32>
    %cst_21 = arith.constant 1.000000e+00 : f32
    %58 = vector.broadcast %cst_21 : f32 to vector<1x256xf32>
    %59 = arith.subf %58, %57 : vector<1x256xf32>
    %cst_22 = arith.constant 1.000000e+00 : f32
    %60 = vector.broadcast %cst_22 : f32 to vector<1x256xf32>
    %61 = arith.subf %60, %57 : vector<1x256xf32>
    %62 = arith.mulf %59, %61 : vector<1x256xf32>
    %63 = arith.mulf %62, %56 : vector<1x256xf32>
    %cst_23 = arith.constant 0.000000e+00 : f32
    %64 = vector.broadcast %cst_23 : f32 to vector<1x256xf32>
    %65 = arith.subf %64, %63 : vector<1x256xf32>
    %cst_24 = arith.constant 0.000000e+00 : f32
    %66 = vector.broadcast %cst_24 : f32 to vector<1x256xf32>
    %67 = arith.select %20, %65, %66 : vector<1x256xi1>, vector<1x256xf32>
    %cst_25 = arith.constant dense<0.000000e+00> : vector<1xf32>
    %68 = vector.multi_reduction <add>, %67, %cst_25 [1] : vector<1x256xf32> to vector<1xf32>
    %69 = vector.shape_cast %68 : vector<1xf32> to vector<1x1xf32>
    %70 = arith.extui %18 : vector<1x256xi1> to vector<1x256xi32>
    %71 = arith.sitofp %70 : vector<1x256xi32> to vector<1x256xf32>
    %cst_26 = arith.constant dense<0.000000e+00> : vector<1xf32>
    %72 = vector.multi_reduction <add>, %71, %cst_26 [1] : vector<1x256xf32> to vector<1xf32>
    %73 = vector.shape_cast %72 : vector<1xf32> to vector<1x1xf32>
    %c0_27 = arith.constant 0 : index
    %c0_28 = arith.constant 0 : index
    %c0_29 = arith.constant 0 : index
    %74 = vector.load %arg6[%c0_27, %c0_28, %c0_29] : memref<1x1x128xf32, #tpu.memory_space<vmem>>, vector<1x1x128xf32>
    %75 = vector.shape_cast %38 : vector<1x1xf32> to vector<1x1x1xf32>
    %76 = vector.broadcast %75 : vector<1x1x1xf32> to vector<1x1x128xf32>
    %77 = arith.addf %74, %76 : vector<1x1x128xf32>
    %c0_30 = arith.constant 0 : index
    %c0_31 = arith.constant 0 : index
    %c0_32 = arith.constant 0 : index
    %78 = vector.load %arg6[%c0_30, %c0_31, %c0_32] : memref<1x1x128xf32, #tpu.memory_space<vmem>>, vector<1x1x128xf32>
    tpu.vector_store %arg6[%c0_30, %c0_31, %c0_32], %77 {strides = array<i32>} : memref<1x1x128xf32, #tpu.memory_space<vmem>>, vector<1x1x128xf32>,
    %c0_33 = arith.constant 0 : index
    %c0_34 = arith.constant 0 : index
    %c0_35 = arith.constant 0 : index
    %79 = vector.load %arg7[%c0_33, %c0_34, %c0_35] : memref<1x1x128xf32, #tpu.memory_space<vmem>>, vector<1x1x128xf32>
    %80 = vector.shape_cast %69 : vector<1x1xf32> to vector<1x1x1xf32>
    %81 = vector.broadcast %80 : vector<1x1x1xf32> to vector<1x1x128xf32>
    %82 = arith.addf %79, %81 : vector<1x1x128xf32>
    %c0_36 = arith.constant 0 : index
    %c0_37 = arith.constant 0 : index
    %c0_38 = arith.constant 0 : index
    %83 = vector.load %arg7[%c0_36, %c0_37, %c0_38] : memref<1x1x128xf32, #tpu.memory_space<vmem>>, vector<1x1x128xf32>
    tpu.vector_store %arg7[%c0_36, %c0_37, %c0_38], %82 {strides = array<i32>} : memref<1x1x128xf32, #tpu.memory_space<vmem>>, vector<1x1x128xf32>,
    %c0_39 = arith.constant 0 : index
    %c0_40 = arith.constant 0 : index
    %c0_41 = arith.constant 0 : index
    %84 = vector.load %arg8[%c0_39, %c0_40, %c0_41] : memref<1x1x128xf32, #tpu.memory_space<vmem>>, vector<1x1x128xf32>
    %85 = vector.shape_cast %73 : vector<1x1xf32> to vector<1x1x1xf32>
    %86 = vector.broadcast %85 : vector<1x1x1xf32> to vector<1x1x128xf32>
    %87 = arith.addf %84, %86 : vector<1x1x128xf32>
    %c0_42 = arith.constant 0 : index
    %c0_43 = arith.constant 0 : index
    %c0_44 = arith.constant 0 : index
    %88 = vector.load %arg8[%c0_42, %c0_43, %c0_44] : memref<1x1x128xf32, #tpu.memory_space<vmem>>, vector<1x1x128xf32>
    tpu.vector_store %arg8[%c0_42, %c0_43, %c0_44], %87 {strides = array<i32>} : memref<1x1x128xf32, #tpu.memory_space<vmem>>, vector<1x1x128xf32>,
    return
  }
  func.func @transform_0(%arg0: i32, %arg1: i32) -> (i32, i32) {
    %c1_i32 = arith.constant 1 : i32
    %0 = arith.muli %arg0, %c1_i32 : i32
    %1 = arith.addi %0, %arg1 : i32
    %c1_i32_0 = arith.constant 1 : i32
    %2 = arith.minsi %1, %c1_i32_0 : i32
    %c0_i32 = arith.constant 0 : i32
    %c0_i32_1 = arith.constant 0 : i32
    return %c0_i32, %2 : i32, i32
  }
  func.func @transform_1(%arg0: i32, %arg1: i32) -> (i32, i32) {
    %c1_i32 = arith.constant 1 : i32
    %0 = arith.muli %arg0, %c1_i32 : i32
    %1 = arith.addi %0, %arg1 : i32
    %c1_i32_0 = arith.constant 1 : i32
    %2 = arith.minsi %1, %c1_i32_0 : i32
    %c0_i32 = arith.constant 0 : i32
    %c0_i32_1 = arith.constant 0 : i32
    return %c0_i32, %2 : i32, i32
  }
  func.func @transform_2(%arg0: i32, %arg1: i32) -> (i32, i32) {
    %c1_i32 = arith.constant 1 : i32
    %0 = arith.muli %arg0, %c1_i32 : i32
    %1 = arith.addi %0, %arg1 : i32
    %c1_i32_0 = arith.constant 1 : i32
    %2 = arith.minsi %1, %c1_i32_0 : i32
    %c0_i32 = arith.constant 0 : i32
    %c0_i32_1 = arith.constant 0 : i32
    return %c0_i32, %2 : i32, i32
  }
  func.func @transform_3(%arg0: i32, %arg1: i32) -> (i32, i32) {
    %c1_i32 = arith.constant 1 : i32
    %0 = arith.muli %arg0, %c1_i32 : i32
    %1 = arith.addi %0, %arg1 : i32
    %c1_i32_0 = arith.constant 1 : i32
    %2 = arith.minsi %1, %c1_i32_0 : i32
    %c0_i32 = arith.constant 0 : i32
    %c0_i32_1 = arith.constant 0 : i32
    return %c0_i32, %2 : i32, i32
  }
  func.func @transform_4(%arg0: i32, %arg1: i32) -> (i32, i32, i32) {
    %c0_i32 = arith.constant 0 : i32
    %c0_i32_0 = arith.constant 0 : i32
    %c0_i32_1 = arith.constant 0 : i32
    return %arg0, %c0_i32, %c0_i32_0 : i32, i32, i32
  }
  func.func @transform_5(%arg0: i32, %arg1: i32) -> (i32, i32, i32) {
    %c0_i32 = arith.constant 0 : i32
    %c0_i32_0 = arith.constant 0 : i32
    %c0_i32_1 = arith.constant 0 : i32
    return %arg0, %c0_i32, %c0_i32_0 : i32, i32, i32
  }
  func.func @transform_6(%arg0: i32, %arg1: i32) -> (i32, i32, i32) {
    %c0_i32 = arith.constant 0 : i32
    %c0_i32_0 = arith.constant 0 : i32
    %c0_i32_1 = arith.constant 0 : i32
    return %arg0, %c0_i32, %c0_i32_0 : i32, i32, i32
  }
}

</mosaic_0001>

<bundles_post_ra>
// kernel: ssd_loss.1
= control target key start
LH: loop header
LB: loop body
LE: loop exit
PB: predicated region body
PF: predicated region fallthrough
CT: control target
= control target key end

     0   :  { %s1300_s0 = inlined_call_operand.hbm [shape: f32[4,512], index: 0, kind: input, shape index: {}]   ;;  %s1301_s1 = inlined_call_operand.hbm [shape: f32[4,512], index: 1, kind: input, shape index: {}]   ;;  %s1302_s2 = inlined_call_operand.hbm [shape: f32[8,512], index: 2, kind: input, shape index: {}]   ;;  %s1303_s3 = inlined_call_operand.vmem [shape: s32[1,512], index: 3, kind: input, shape index: {}]   ;;  %s1304_s4 = inlined_call_operand.vmem [shape: f32[2,1,128], index: 4, kind: output, shape index: {0}]   ;;  %s1305_s5 = inlined_call_operand.vmem [shape: f32[2,1,128], index: 5, kind: output, shape index: {1}]   ;;  %s1306_s6 = inlined_call_operand.vmem [shape: f32[2,1,128], index: 6, kind: output, shape index: {2}]  }
   0x1   :  { %1311 = sst [smem:[#allocation13_spill]] %s1301_s1 }
   0x2   :  { %1312 = sst [smem:[#allocation14_spill]] %s1305_s5 }
   0x3   :  { %12 = vsyncpa [#allocation3], 0 }
   0x4   :  { %14 = vsyncpa [#allocation3 + $0x1], 0 }
   0x5   :  { %15 = vsyncpa [#allocation5], 0 }
   0x6   :  { %17 = vsyncpa [#allocation5 + $0x1], 0  ;;  %s1097_s21 = smov 0   ;;  %s1099_s22 = smov 0  }
   0x7   :  { %s1101_s23 = smov 0   ;;  %s1103_s24 = smov 0  }
   0x8   :  { %s1105_s25 = smov 0   ;;  %s1107_s26 = smov 0  }
   0x9 LB: > { %1313 = sst [smem:[#allocation9_spill]] %s1045_s23  ;;  %s1307_s27 = sadd.s32 4294967295, %s1057_s26   ;;  %s1057_s26 = sphi %s1107_s26, %s23_s26   ;;  %s1053_s25 = sphi %s1105_s25, %s1330_s25   ;;  %s1049_s24 = sphi %s1103_s24, %s1333_s24   ;;  %s1045_s23 = sphi %s1101_s23, %s1328_s23   ;;  %s1041_s22 = sphi %s1099_s22, %s1332_s22   ;;  %s1037_s21 = sphi %s1097_s21, %s1331_s21  }
   0xa   : > { %1314 = sst [smem:[#allocation10_spill]] %s1053_s25  ;;  %s35_s28 = sadd.s32 1, %s1053_s25 }
   0xb   : > { %p37_p0 = scmp.ge.s32.totalorder %s35_s28, 2  ;;  %p40_p1 = scmp.lt.s32.totalorder %s1053_s25, 1 }
   0xc   : > { %s48_s29 = sadd.s32 1, %s1045_s23  ;;  %p55_p2 = scmp.ne.s32.totalorder %s1045_s23, %s1041_s22 }
   0xd   : > { %s1335_s28 = smov (%p37_p0, %s35_s28), 0  ;;  %p56_p4 = scmp.eq.s32.totalorder %s1057_s26, 0 }
   0xe   : > { %1315 = sst [smem:[#allocation11_spill]] %s1335_s28  ;;  %p43_p3 = scmp.lt.s32.totalorder %s1335_s28, 1 }
   0xf   : > { %s1134_s30 = scalar_select %p40_p1, %s1053_s25, 1 }
  0x10   : > { %p61_p5 = scmp.ne.s32.totalorder %s1041_s22, %s1037_s21  ;;  %p62_p6 = scmp.eq.s32.totalorder %s1307_s27, 0 }
  0x11   : > { %s44_s7 = scalar_select %p43_p3, %s1335_s28, 1 }
  0x12   : > { %p57_p7 = por %p56_p4, %p55_p2  ;;  %p1142_p8 = por %p62_p6, %p61_p5 }
  0x13   : > { %s45_s9 = ssub.s32 %s1134_s30, %s44_s7  ;;  %p849_p10 = scmp.lt.s32.totalorder %s1057_s26, 2 }
  0x14   : > { %p46_p9 = scmp.eq.s32.totalorder %s45_s9, 0  ;;  %s259_s10 = sand.u32 1, %s1045_s23  }
  0x15   : > { %s830_s11 = sshll.u32 %s1134_s30, 3  ;;  %s811_s13 = sshll.u32 %s259_s10, 3 }
  0x16   : > { %s1151_s12 = scalar_select %p46_p9, %s1045_s23, %s48_s29  }
  0x17   : > { %p1153_p11 = pnand %p849_p10, %p57_p7  ;;  %s282_s15 = sand.u32 1, %s1057_s26  }
  0x18   : > { %1317 = sst [smem:[#allocation12_spill]] %s1151_s12  ;;  %s286_s19 = scalar_lea.vmem [#allocation4], %s811_s13 }
  0x19   : > { %s1319_s1 = sld [smem:[#allocation13_spill]]  ;;  %s298_s20 = sshll.u32 %s286_s19, 4  ;;  %s299_s20 = int_to_ptr.vmem [resolvable:$true] %s298_s20 }
  0x1a   : > { %p820_p12 = scmp.ge.s32.totalorder %s1057_s26, 1  ;;  %s283_s29 = scalar_lea.sflag [#allocation5], %s282_s15 }
  0x1b   : > { %p340_p13 = scmp.lt.s32.totalorder %s1057_s26, 3  ;;  %s271_s16 = scalar_lea.hbm %s1300_s0, %s830_s11 }
  0x1c   : > { %s263_s17 = scalar_lea.vmem [#allocation2], %s811_s13  ;;  %s273_s19 = sshll.u32 %s271_s16, 4  ;;  %s274_s19 = int_to_ptr.hbm [resolvable:$true] %s273_s19 }
  0x1d   : > { %p1165_p0 = pnand %p820_p12, %p340_p13  ;;  %s260_s28 = scalar_lea.sflag [#allocation3], %s259_s10 }
  0x1e   : > { %s832_s15 = sshll.u32 %s1134_s30, 4  ;;  %s346_s27 = sand.u32 (!%p1165_p0), 1, %s1041_s22  }
  0x1f   : > { %s294_s18 = scalar_lea.hbm %s1319_s1, %s830_s11  ;;  %s817_s1 = sshll.u32 %s259_s10, 4 }
  0x20   : > { %s296_s21 = sshll.u32 %s294_s18, 4  ;;  %s275_s18 = sshll.u32 %s263_s17, 4  ;;  %s297_s21 = int_to_ptr.hbm [resolvable:$true] %s296_s21  ;;  %s276_s18 = int_to_ptr.vmem [resolvable:$true] %s275_s18 }
  0x21   : > { %845 = dma.hbm_to_vmem [thread:$0]  (!%p1153_p11), %s297_s21, 128, %s299_s20, %s283_s29  }
  0x22   : > { %842 = dma.hbm_to_vmem [thread:$0]  (!%p1153_p11), %s274_s19, 128, %s276_s18, %s260_s28  }
  0x23   : > { %s317_s25 = scalar_lea.hbm %s1302_s2, %s832_s15  ;;  %s309_s12 = scalar_lea.vmem [#allocation6], %s817_s1 }
  0x24   : > { %s321_s23 = sshll.u32 %s309_s12, 4  ;;  %s319_s5 = sshll.u32 %s317_s25, 4  ;;  %s322_s23 = int_to_ptr.vmem [resolvable:$true] %s321_s23  ;;  %s320_s5 = int_to_ptr.hbm [resolvable:$true] %s319_s5 }
  0x25   : > { %848 = dma.hbm_to_vmem [thread:$0]  (!%p1153_p11), %s320_s5, 256, %s322_s23, %s283_s29  }
  0x26   : > { %344 = sbr.rel (%p1165_p0) target bundleno = 247 (0xf7), region = 36  ;;  %s821_s10 = sshll.u32 (!%p1165_p0), %s346_s27, 3 }
  0x27   : > { %s347_s28 = scalar_lea.sflag (!%p1165_p0), [#allocation3], %s346_s27  ;;  %s350_s30 = scalar_lea.vmem (!%p1165_p0), [#allocation2], %s821_s10 }
  0x2b   : > { %1028 = dma.done.wait (%p1142_p8), %s347_s28, 128  }
  0x2c   : > { %1030 = vsyncadd (%p1142_p8), %s347_s28, 4294967168  ;;  %s1321_s1 = sadd.s32 4294967295, %s1057_s26   ;;  %s360_s5 = scalar_lea.vmem [#allocation4], %s821_s10 }
  0x2d   : > { %s356_s25 = sand.u32 1, %s1321_s1  }
  0x2e   : > { %s357_s11 = scalar_lea.sflag [#allocation5], %s356_s25 }
  0x2f   : > { %1032 = dma.done.wait (%p1142_p8), %s357_s11, 384  }
  0x30   : > { %1034 = vsyncadd (%p1142_p8), %s357_s11, 4294966912  ;;  %p434_p1 = scmp.lt.s32.totalorder %s1049_s24, 1  ;;  %v462_v0 = vlaneseq  ;;  %s823_s23 = sshll.u32 %s346_s27, 4  ;;  %v483_v6 = vld [vmem:[%s350_s30] sm:$0xff]  ;;  %v484_v7 = vld [vmem:[%s360_s5] sm:$0xff]  ;;  %v1059_v12 = vmov 0  }
  0x31   : > { %s825_s12 = sshll.u32 %s1049_s24, 8  ;;  %s370_s8 = scalar_lea.vmem [#allocation6], %s823_s23  ;;  %v485_v9 = vsub.f32 %v483_v6, %v484_v7  ;;  %vm477_vm2 = vcmask 1040384   ;;  %v1060_v30 = vmov 0.0   ;;  %vm1061_vm8 = vmmov 1  }
  0x32   : > { %s1337_s24 = smov (!%p434_p1, %s1049_s24), 1  ;;  %v463_v1 = vand.u32 127, %v462_v0  ;;  %v465_v2 = vstv %s825_s12  ;;  %v1200_v8 = vld [vmem:[%s370_s8] sm:$0xff]  ;;  %v1202_v10 = vld [vmem:[%s370_s8 + $0x8] sm:$0xff]  ;;  %vm498_vm11 = vcmask 1043456   ;;  %v568_v51 = vshrl.u32 %v462_v0, 7 }
  0x33   : > { %s824_s13 = sshll.u32 %s1337_s24, 1  ;;  %v531_v11 = vrot.slane %v1200_v8, 4  ;;  %v537_v15 = vrot.slane %v1202_v10, 4  ;;  %v486_v18 = vand.u32 2147483647, %v485_v9  ;;  %s1217_s17 = scalar_lea.vmem %s1304_s4, %s1337_s24 }
  0x34   : > { %v464_v3 = vadd.s32 128, %v463_v1  ;;  %v466_v4 = vadd.s32 %v465_v2, %v463_v1  ;;  %p437_p2 = scmp.lt.s32.totalorder %s824_s13, 3  ;;  %457 = vst [vmem:[%s1217_s17] sm:$0x1] %v1060_v30  ;;  %s1252_s15 = scalar_lea.vmem %s1306_s6, %s1337_s24 }
  0x35   : > { %v532_v19 = vmax.f32 %v1200_v8, %v531_v11  ;;  %v538_v20 = vmax.f32 %v1202_v10, %v537_v15  ;;  %v488_v23 = vmul.f32 0.5, %v486_v18  ;;  %vm487_vm6 = vcmp.lt.f32.partialorder %v486_v18, 1.0  ;;  %s1326_s27 = sld [smem:[#allocation14_spill]]  ;;  %459 = vst [vmem:[%s1252_s15] sm:$0x1] %v1060_v30 }
  0x36   : > { %v467_v5 = vadd.s32 %v465_v2, %v464_v3  ;;  %vm468_vm0 = vcmp.lt.s32.totalorder %v466_v4, 512  ;;  %s1339_s13 = smov (!%p437_p2, %s824_s13), 3  ;;  %v826_v24 = vadd.f32 -0.5, %v486_v18 }
  0x37   : > { %s439_s7 = scalar_lea.vmem %s1303_s3, %s1339_s13  ;;  %v474_v13 = vsel %vm468_vm0, 1, %v1059_v12  ;;  %v489_v25 = vmul.f32 %v488_v23, %v486_v18  ;;  %v533_v26 = vrot.slane %v532_v19, 2  ;;  %v539_v27 = vrot.slane %v538_v20, 2 }
  0x38   : > { %vm469_vm1 = vcmp.lt.s32.totalorder %v467_v5, 512  ;;  %v470_v16 = vld [vmem:[%s439_s7] sm:$0x3] }
  0x39   : > { %v475_v14 = vsel %vm469_vm1, 1, %v1059_v12  ;;  %vm471_vm3 = vcmp.lt.s32.totalorder %v470_v16, 0  ;;  %v491_v29 = vsel %vm487_vm6, %v489_v25, %v826_v24  ;;  %v534_v35 = vmax.f32 %v532_v19, %v533_v26 }
  0x3a   : > { %v476_v17 = vrot.slane %v475_v14, 7  ;;  %v472_v21 = vsel %vm471_vm3, 0, %v470_v16  ;;  %vm481_vm9 = vmxor %vm471_vm3, %vm1061_vm8  ;;  %493 = vst [vmem:[#allocation1] ss:$2 sm:$0xff] %v491_v29  ;;  %v540_v36 = vmax.f32 %v538_v20, %v539_v27 }
  0x3b   : > { %vm473_vm4 = vcmp.gt.s32.totalorder %v472_v21, 0  ;;  %v535_v40 = vrot.slane %v534_v35, 1  ;;  %v569_v44 = vperm.slane %v472_v21, 0  ;;  %v570_v52 = vperm.slane %v472_v21, 1  ;;  %s1258_s10 = scalar_lea.vmem %s1326_s27, %s1337_s24 }
  0x3c   : > { %v478_v22 = vsel %vm477_vm2, %v474_v13, %v476_v17  ;;  %v541_v41 = vrot.slane %v540_v36, 1  ;;  %458 = vst [vmem:[%s1258_s10] sm:$0x1] %v1060_v30 }
  0x3d   : > { %vm479_vm5 = vcmp.ne.s32.totalorder %v478_v22, 0  ;;  %v1237_v42 = vmax.f32 %v534_v35, %v535_v40  ;;  %vm571_vm12 = vcmp.eq.s32.totalorder %v568_v51, %v569_v44  ;;  %vm572_vm13 = vcmp.eq.s32.totalorder %v568_v51, %v570_v52 }
  0x3e   : > { %vm1220_vm7 = vmand %vm473_vm4, %vm479_vm5  ;;  %v1239_v43 = vmax.f32 %v540_v36, %v541_v41  ;;  %v573_v61 = vsel %vm571_vm12, %v1200_v8, 0.0  ;;  %v574_v0 = vsel %vm572_vm13, %v1202_v10, 0.0 }
  0x3f   : > { %v827_v31 = vsel %vm1220_vm7, 1.0, %v1060_v30  ;;  %vm1231_vm10 = vmand %vm481_vm9, %vm479_vm5  ;;  %v543_v47 = vsub.f32 %v1200_v8, %v1237_v42  ;;  %v575_v4 = vrot.slane %v573_v61, 4  ;;  %v581_v6 = vrot.slane %v574_v0, 4 }
  0x40   : > { %v620_v32 = vperm.slane %v827_v31, 0  ;;  %v621_v33 = vperm.slane %v827_v31, 1  ;;  %v544_v48 = vsub.f32 %v1202_v10, %v1239_v43 }
  0x41   : > { %v494_v45 = vld.sshfl [vmem:[#allocation1] sm:$0xff pattern:$0x75316420]  ;;  %v495_v46 = vld.sshfl [vmem:[#allocation1 + $0x8] sm:$0xff pattern:$0x75316420]  ;;  %v576_v10 = vadd.f32 %v575_v4, %v573_v61  ;;  %v582_v15 = vadd.f32 %v581_v6, %v574_v0 }
  0x42   : > { %v624_v37 = vsel %vm477_vm2, %v620_v32, 0.0  ;;  %v625_v38 = vsel %vm477_vm2, %v621_v33, 0.0  ;;  %v499_v49 = vsel %vm498_vm11, %v494_v45, 0.0  ;;  %v506_v50 = vsel %vm498_vm11, %v495_v46, 0.0  ;;  %v635_v4 = vld [vmem:[%s1252_s15] sm:$0x1] }
  0x43   : > { %v626_v39 = vadd.f32 %v625_v38, %v624_v37  ;;  %v500_v53 = vrot.slane %v499_v49, 4  ;;  %v507_v54 = vrot.slane %v506_v50, 4  ;;  %v545_v55 = vmul.f32 1.442695, %v543_v47  ;;  %v632_v34 = vld [vmem:[%s1258_s10] sm:$0x1] }
  0x44   : > { %v547_v56 = vmul.f32 1.442695, %v544_v48  ;;  %v577_v23 = vrot.slane %v576_v10, 2  ;;  %v583_v25 = vrot.slane %v582_v15, 2 }
  0x45   : > { %627 = vadd.xlane.f32.xlu1 %v626_v39  ;;  %v501_v57 = vadd.f32 %v500_v53, %v499_v49  ;;  %v508_v58 = vadd.f32 %v507_v54, %v506_v50  ;;  %901 = vpow2.f32 %v545_v55 }
  0x46   : > { %903 = vpow2.f32 %v547_v56  ;;  %v578_v33 = vadd.f32 %v577_v23, %v576_v10  ;;  %v584_v36 = vadd.f32 %v583_v25, %v582_v15 }
  0x47   : > { %v502_v59 = vrot.slane %v501_v57, 2  ;;  %v509_v60 = vrot.slane %v508_v58, 2 }
  0x48   : > { %v579_v28 = vrot.slane %v578_v33, 1  ;;  %v585_v37 = vrot.slane %v584_v36, 1 }
  0x49   : > { %v503_v62 = vadd.f32 %v502_v59, %v501_v57  ;;  %v510_v63 = vadd.f32 %v509_v60, %v508_v58 }
  0x4a   : > { %v580_v41 = vadd.f32 %v579_v28, %v578_v33  ;;  %v586_v45 = vadd.f32 %v585_v37, %v584_v36 }
  0x4b   : > { %v902_v1 = vpop.eup %901  ;;  %v504_v2 = vrot.slane %v503_v62, 1  ;;  %v511_v3 = vrot.slane %v510_v63, 1 }
  0x4c   : > { %v904_v5 = vpop.eup %903  ;;  %v549_v7 = vrot.slane %v902_v1, 4 }
  0x4d   : > { %v505_v9 = vadd.f32 %v504_v2, %v503_v62  ;;  %v512_v11 = vadd.f32 %v511_v3, %v510_v63  ;;  %v555_v12 = vrot.slane %v904_v5, 4 }
  0x4e   : > { %v550_v13 = vadd.f32 %v902_v1, %v549_v7  ;;  %v629_v7 = vld [vmem:[%s1217_s17] sm:$0x1] }
  0x4f   : > { %v515_v8 = vrot.slane %v512_v11, 7  ;;  %v556_v14 = vadd.f32 %v904_v5, %v555_v12 }
  0x50   : > { %v551_v16 = vrot.slane %v550_v13, 2 }
  0x51   : > { %v516_v17 = vsel %vm477_vm2, %v505_v9, %v515_v8  ;;  %v557_v18 = vrot.slane %v556_v14, 2 }
  0x52   : > { %v518_v19 = vsel %vm1220_vm7, %v516_v17, 0.0  ;;  %v552_v20 = vadd.f32 %v551_v16, %v550_v13 }
  0x53   : > { %v520_v21 = vperm.slane %v518_v19, 0  ;;  %v521_v22 = vperm.slane %v518_v19, 1  ;;  %v558_v24 = vadd.f32 %v557_v18, %v556_v14 }
  0x54   : > { %v553_v26 = vrot.slane %v552_v20, 1 }
  0x55   : > { %v524_v27 = vsel %vm477_vm2, %v520_v21, 0.0  ;;  %v525_v29 = vsel %vm477_vm2, %v521_v22, 0.0  ;;  %v559_v31 = vrot.slane %v558_v24, 1 }
  0x56   : > { %v526_v32 = vadd.f32 %v525_v29, %v524_v27  ;;  %v554_v30 = vadd.f32 %v553_v26, %v552_v20 }
  0x57   : > { %v560_v35 = vadd.f32 %v559_v31, %v558_v24 }
  0x58   : > { %527 = vadd.xlane.f32.xlu0 %v526_v32  ;;  %905 = vlog2.f32 %v554_v30 }
  0x59   : > { %907 = vlog2.f32 %v560_v35 }
  0x5e   : > { %v906_v38 = vpop.eup %905 }
  0x5f   : > { %v908_v39 = vpop.eup %907  ;;  %v562_v40 = vmul.f32 0.6931472, %v906_v38 }
  0x60   : > { %v564_v44 = vmul.f32 0.6931472, %v908_v39 }
  0x61   : > { %v565_v46 = vadd.f32 %v562_v40, %v1237_v42 }
  0x62   : > { %v566_v47 = vadd.f32 %v564_v44, %v1239_v43 }
  0x63   : > { %v587_v48 = vsub.f32 %v580_v41, %v565_v46 }
  0x64   : > { %v588_v49 = vsub.f32 %v586_v45, %v566_v47 }
  0x65   : > { %v589_v50 = vmul.f32 1.442695, %v587_v48 }
  0x66   : > { %v591_v51 = vmul.f32 1.442695, %v588_v49 }
  0x67   : > { %909 = vpow2.f32 %v589_v50 }
  0x68   : > { %911 = vpow2.f32 %v591_v51 }
  0x6d   : > { %v910_v52 = vpop.eup %909 }
  0x6e   : > { %v912_v53 = vpop.eup %911  ;;  %v593_v54 = vsub.f32 1.0, %v910_v52 }
  0x6f   : > { %v594_v55 = vsub.f32 1.0, %v912_v53 }
  0x70   : > { %v595_v56 = vmul.f32 %v593_v54, %v593_v54 }
  0x71   : > { %v596_v57 = vmul.f32 %v594_v55, %v594_v55 }
  0x72   : > { %v597_v58 = vmul.f32 %v595_v56, %v587_v48 }
  0x73   : > { %v598_v59 = vmul.f32 %v596_v57, %v588_v49 }
  0x74   : > { %v599_v42 = vsub.f32 0.0, %v597_v58 }
  0x75   : > { %v600_v60 = vsub.f32 0.0, %v598_v59 }
  0x77   : > { %v603_v43 = vrot.slane %v600_v60, 7 }
  0x79   : > { %v604_v61 = vsel %vm477_vm2, %v599_v42, %v603_v43 }
  0x7a   : > { %v606_v62 = vsel %vm1231_vm10, %v604_v61, 0.0 }
  0x7b   : > { %v608_v63 = vperm.slane %v606_v62, 0  ;;  %v609_v0 = vperm.slane %v606_v62, 1 }
  0x7d   : > { %v612_v1 = vsel %vm477_vm2, %v608_v63, 0.0  ;;  %v613_v2 = vsel %vm477_vm2, %v609_v0, 0.0 }
  0x7e   : > { %v614_v3 = vadd.f32 %v613_v2, %v612_v1 }
  0x80   : > { %615 = vadd.xlane.f32.xlu0 %v614_v3 }
  0xb8   : > { %v628_v5 = vpop.xlane.xlu1 %627 }
  0xb9   : > { %v636_v6 = vadd.f32 %v635_v4, %v628_v5 }
  0xbb   : > { %637 = vst [vmem:[%s1252_s15] sm:$0x1] %v636_v6 }
  0xcb   : > { %v528_v9 = vpop.xlane.xlu0 %527 }
  0xcc   : > { %v630_v11 = vadd.f32 %v629_v7, %v528_v9 }
  0xce   : > { %631 = vst [vmem:[%s1217_s17] sm:$0x1] %v630_v11 }
  0xf3   : > { %v616_v12 = vpop.xlane.xlu0 %615 }
  0xf4   : > { %v633_v13 = vadd.f32 %v632_v34, %v616_v12 }
  0xf6   : > { %634 = vst [vmem:[%s1258_s10] sm:$0x1] %v633_v13 }
  0xf7 PF: > { %s23_s26 = sadd.s32 1, %s1057_s26   ;;  %s1327_s24 = sld [smem:[#allocation9_spill]] }
  0xf8   : > { %p20_p3 = scmp.ge.s32.totalorder %s23_s26, 4   ;;  %s1328_s23 = sld [smem:[#allocation12_spill]] }
  0xf9   : > { %s1329_s28 = sld [smem:[#allocation10_spill]]  ;;  %s1331_s21 = smov %s1041_s22 }
  0xfa   : > { %s1330_s25 = sld [smem:[#allocation11_spill]] }
  0xfb   :  { %22 = sbr.rel (!%p20_p3) target bundleno = 9 (0x9), region = 131 }
  0xfd   : > { %s1332_s22 = smov %s1327_s24 }
  0xff   : > { %s1333_s24 = smov %s1329_s28 }
 0x100   :  { %679 = vsyncpa [#allocation3], 1 }
 0x101   :  { %681 = vsyncpa [#allocation3 + $0x1], 1 }
 0x102   :  { %682 = vsyncpa [#allocation5], 1 }
 0x103   :  { %684 = vsyncpa [#allocation5 + $0x1], 1 }

</bundles_post_ra>
